<compile_context>
chip_gen: v5e
topology: v5e:2x2
jax: 0.10.0
libtpu: 0.0.40
codegen_flags: <defaults>
</compile_context>

<pallas_src>
import math

import jax
import jax.numpy as jnp
from jax.experimental import pallas as pl
from jax.experimental.pallas import tpu as pltpu

LN_EPS = 1e-5
ROW_GRAN = 16      # sublane granularity for bf16-packed row tiles


def _round_up(n, m):
    return ((n + m - 1) // m) * m


def _pad_cols(a, width):
    pad = width - a.shape[-1]
    if pad == 0:
        return a
    return jnp.pad(a, [(0, 0)] * (a.ndim - 1) + [(0, pad)])


def _tpu_vmem_capacity():
    try:
        cap = getattr(pltpu.get_tpu_info(), "vmem_capacity_bytes", None)
        if cap:
            return int(cap)
    except Exception:
        pass
    return 0


def _make_grn_kernel(has_skip, d_hid, d_hid_p, d_out, d_out_p):
    def kernel(x_ref, w1s_ref, b1s_ref, w2g_ref, b2g_ref, ln_ref, o_ref):
        x = x_ref[...]                                   # (rows, D_in)
        x_mm = x.astype(jnp.bfloat16)                    # no-op on the bf16 path

        # Fused linear1 (+ skip projection): a single MXU pass over x.
        hs = jnp.dot(x_mm, w1s_ref[...], preferred_element_type=jnp.float32)
        hs = hs + b1s_ref[...]
        if has_skip:
            h = hs[:, :d_hid]             # prefix slice: layout-preserving
            skip = hs[:, d_hid_p:]        # starts on a 128-lane boundary: free
        else:
            h = hs
            skip = x.astype(jnp.float32)  # identity residual, exact f32

        # ELU(alpha=1). exp arg clamped <= 0 so the discarded branch never
        # overflows (expm1 lowering in Mosaic is not guaranteed, so avoided).
        h = jnp.where(h > 0.0, h, jnp.exp(jnp.minimum(h, 0.0)) - 1.0)
        # TODO(synk): nn.Dropout(0.1) is identity in eval mode; training-mode
        # stochastic masking (pltpu.prng_*) is not implemented here.
        h = h.astype(jnp.bfloat16)        # single bf16 copy feeds the fused matmul

        # Fused linear2 + gate: one MXU pass over [W2(pad128) | Wg].
        og = jnp.dot(h, w2g_ref[...], preferred_element_type=jnp.float32)
        og = og + b2g_ref[...]
        out = og[:, :d_out]               # prefix slice: free
        z = og[:, d_out_p:]               # 128-aligned start: free
        gate = pl.reciprocal(1.0 + jnp.exp(-z), approx=True)   # EUP exp + EUP rcp

        y = out * gate + skip

        # LayerNorm over the last dim (f32 math).
        mean = jnp.mean(y, axis=-1, keepdims=True)
        c = y - mean
        var = jnp.mean(c * c, axis=-1, keepdims=True)
        yn = c * jax.lax.rsqrt(var + LN_EPS)
        # TODO(synk): for D_out < 128 this store is lane-masked; a lane-dense
        # repack (128/D_out rows per lane-row) would speed the store tail but
        # needs a last-two-dim reshape Mosaic does not lower reliably.
        o_ref[...] = (yn * ln_ref[0:1, :] + ln_ref[1:2, :]).astype(o_ref.dtype)

    return kernel


def grn_forward(x, params, *, row_tile=None):
    """x: [B, S, D_in]. Returns [B, S, D_out] in x.dtype."""
    B, S, D_in = x.shape
    w1, b1, w2, b2, wg, bg, ws, bs, gamma, beta = params
    D_hid = w1.shape[1]
    D_out = w2.shape[1]
    has_skip = ws is not None
    if not has_skip:
        assert D_in == D_out, "identity residual requires input_dim == output_dim"

    # Lane-aligned fused weight layout so all in-kernel splits are free.
    D_hid_p = _round_up(D_hid, 128) if has_skip else D_hid
    D_out_p = _round_up(D_out, 128)

    vmem_cap = _tpu_vmem_capacity()

    # Row tiling: large tiles on 128 MiB-VMEM parts (v5e/v6e), smaller on v7x;
    # shrink the tile instead of padding a ragged N up to a full tile.
    if row_tile is None:
        row_tile = 1024 if vmem_cap >= (100 << 20) else 512
    N = B * S
    rt = max(ROW_GRAN, min(_round_up(row_tile, ROW_GRAN), _round_up(N, ROW_GRAN)))
    while rt > 128 and (_round_up(N, rt) - N) * 8 > N:   # cap padding waste ~12.5%
        rt = _round_up(rt // 2, ROW_GRAN)
    N_pad = _round_up(N, rt)
    grid_rows = N_pad // rt

    # bf16 x on the skip-projection path (x only feeds matmuls there); f32 x on
    # the identity path so the residual add stays exact.
    x_dt = jnp.bfloat16 if has_skip else jnp.float32
    x2d = x.reshape(N, D_in).astype(x_dt)
    if N_pad != N:
        x2d = jnp.pad(x2d, ((0, N_pad - N), (0, 0)))

    # Fused / packed operands (bf16 weights: half the DMA + full-rate MXU).
    if has_skip:
        w1s = jnp.concatenate([_pad_cols(w1, D_hid_p), ws], axis=1)
        b1s = jnp.concatenate([_pad_cols(b1.reshape(1, -1), D_hid_p),
                               bs.reshape(1, -1)], axis=1)
    else:
        w1s = w1
        b1s = b1.reshape(1, -1)
    w1s = w1s.astype(jnp.bfloat16)
    b1s = b1s.astype(jnp.float32)
    w2g = jnp.concatenate([_pad_cols(w2, D_out_p), wg], axis=1).astype(jnp.bfloat16)
    b2g = jnp.concatenate([_pad_cols(b2.reshape(1, -1), D_out_p),
                           bg.reshape(1, -1)], axis=1).astype(jnp.float32)
    ln_pack = jnp.stack([gamma, beta], axis=0).astype(jnp.float32)   # (2, D_out)

    W1_cols = w1s.shape[1]
    W2_cols = w2g.shape[1]

    def rep(shape):
        # TODO(synk): pipeline_mode=pl.Buffered(1) would single-buffer these
        # grid-invariant weights and halve their VMEM footprint (v7x win).
        return pl.BlockSpec(shape, lambda i: (0, 0))

    in_specs = [
        pl.BlockSpec((rt, D_in), lambda i: (i, 0)),   # x rows
        rep((D_in, W1_cols)),                         # [W1(pad) | Ws]  bf16
        rep((1, W1_cols)),                            # [b1(pad) | bs]
        rep((D_hid, W2_cols)),                        # [W2(pad) | Wg]  bf16
        rep((1, W2_cols)),                            # [b2(pad) | bg]
        rep((2, D_out)),                              # [gamma; beta]
    ]
    args = [x2d, w1s, b1s, w2g, b2g, ln_pack]

    flops = 2 * N_pad * (D_in * W1_cols + D_hid * W2_cols)
    transcendentals = N_pad * (D_hid + D_out)
    bytes_accessed = (x2d.dtype.itemsize * N_pad * D_in + 4 * N_pad * D_out
                      + 2 * (D_in * W1_cols + D_hid * W2_cols)
                      + 4 * (W1_cols + W2_cols + 2 * D_out))

    if vmem_cap:
        vmem_limit = max(32 << 20, min(vmem_cap * 3 // 4, 100 << 20))
    else:
        vmem_limit = 48 << 20   # conservative fallback (fits v7x's 64 MiB)

    out2d = pl.pallas_call(
        _make_grn_kernel(has_skip, D_hid, D_hid_p, D_out, D_out_p),
        out_shape=jax.ShapeDtypeStruct((N_pad, D_out), x.dtype),
        grid_spec=pltpu.PrefetchScalarGridSpec(
            num_scalar_prefetch=0,
            grid=(grid_rows,),
            in_specs=in_specs,
            out_specs=pl.BlockSpec((rt, D_out), lambda i: (i, 0)),
        ),
        # TODO(synk): on v7x, pltpu.CORE_PARALLEL on this axis would shard rows
        # across both TensorCores; "parallel" is kept for portability.
        compiler_params=pltpu.CompilerParams(
            dimension_semantics=("parallel",),
            vmem_limit_bytes=int(vmem_limit)),
        cost_estimate=pl.CostEstimate(
            flops=int(flops), transcendentals=int(transcendentals),
            bytes_accessed=int(bytes_accessed)),
    )(*args)

    return out2d[:N].reshape(B, S, D_out)


def init_params(key, input_dim, hidden_dim, output_dim):
    """nn.Linear default init (uniform +/- 1/sqrt(fan_in)); weights stored [in, out]."""
    ks = jax.random.split(key, 8)

    def linear(kw, kb, fan_in, fan_out):
        bound = 1.0 / math.sqrt(fan_in)
        w = jax.random.uniform(kw, (fan_in, fan_out), jnp.float32, -bound, bound)
        b = jax.random.uniform(kb, (fan_out,), jnp.float32, -bound, bound)
        return w, b

    w1, b1 = linear(ks[0], ks[1], input_dim, hidden_dim)
    w2, b2 = linear(ks[2], ks[3], hidden_dim, output_dim)
    wg, bg = linear(ks[4], ks[5], hidden_dim, output_dim)
    if input_dim != output_dim:
        ws, bs = linear(ks[6], ks[7], input_dim, output_dim)
    else:
        ws, bs = None, None       # skip_connection is None -> identity residual
    gamma = jnp.ones((output_dim,), jnp.float32)
    beta = jnp.zeros((output_dim,), jnp.float32)
    return (w1, b1, w2, b2, wg, bg, ws, bs, gamma, beta)


def grn_reference(x, params, *, bf16_matmul=True):
    """Pure-JAX reference. bf16_matmul=True matches the kernel's MXU precision."""
    w1, b1, w2, b2, wg, bg, ws, bs, gamma, beta = params
    in_dt = jnp.bfloat16 if bf16_matmul else jnp.float32

    def mm(a, w):
        return jnp.dot(a.astype(in_dt), w.astype(in_dt),
                       preferred_element_type=jnp.float32)

    h = mm(x, w1) + b1
    h = jnp.where(h > 0.0, h, jnp.expm1(jnp.minimum(h, 0.0)))
    out = mm(h, w2) + b2
    gate = jax.nn.sigmoid(mm(h, wg) + bg)
    out = out * gate
    skip = (mm(x, ws) + bs) if ws is not None else x
    y = out + skip
    mean = jnp.mean(y, axis=-1, keepdims=True)
    c = y - mean
    var = jnp.mean(c * c, axis=-1, keepdims=True)
    return c * jax.lax.rsqrt(var + LN_EPS) * gamma + beta


if __name__ == "__main__":
    key = jax.random.PRNGKey(0)
    kx1, kp1, kx2, kp2 = jax.random.split(key, 4)

    # Config 1: input_dim != output_dim -> learned skip projection (fused into W1).
    B, S = 2, 8
    d_in, d_hid, d_out = 4, 32, 8
    x = jax.random.normal(kx1, (B, S, d_in), jnp.float32)
    params = init_params(kp1, d_in, d_hid, d_out)
    y = jax.block_until_ready(grn_forward(x, params))
    assert y.shape == (B, S, d_out)
    y_mref = grn_reference(x, params, bf16_matmul=True)
    assert jnp.allclose(y, y_mref, atol=1e-2, rtol=1e-2), \
        "mismatch vs matched-precision reference (skip projection)"
    y_f32 = grn_reference(x, params, bf16_matmul=False)
    assert jnp.allclose(y, y_f32, atol=5e-2, rtol=5e-2), \
        "mismatch vs f32 reference (skip projection)"

    # Config 2: input_dim == output_dim -> identity residual (f32 x, no skip matmul).
    d_in2, d_hid2, d_out2 = 8, 32, 8
    x2 = jax.random.normal(kx2, (B, S, d_in2), jnp.float32)
    params2 = init_params(kp2, d_in2, d_hid2, d_out2)
    y2 = jax.block_until_ready(grn_forward(x2, params2))
    assert y2.shape == (B, S, d_out2)
    y2_mref = grn_reference(x2, params2, bf16_matmul=True)
    assert jnp.allclose(y2, y2_mref, atol=1e-2, rtol=1e-2), \
        "mismatch vs matched-precision reference (identity residual)"

    print("KERNEL_OK")
</pallas_src>

<mosaic_0001>
module attributes {stable_mosaic.version = 11 : i64} {
  func.func @kernel(%arg0: i32, %arg1: memref<16x4xbf16, #tpu.memory_space<vmem>>, %arg2: memref<4x136xbf16, #tpu.memory_space<vmem>>, %arg3: memref<1x136xf32, #tpu.memory_space<vmem>>, %arg4: memref<32x136xbf16, #tpu.memory_space<vmem>>, %arg5: memref<1x136xf32, #tpu.memory_space<vmem>>, %arg6: memref<2x8xf32, #tpu.memory_space<vmem>>, %arg7: memref<16x8xf32, #tpu.memory_space<vmem>>) attributes {dimension_semantics = [#tpu.dimension_semantics<parallel>], iteration_bounds = array<i64: 1>, scalar_prefetch = 0 : i64, scratch_operands = 0 : i64, tpu.core_type = #tpu.core_type<tc>, window_params = [{transform_indices = @transform_0, window_bounds = array<i64: 16, 4>}, {pipeline_mode = #tpu.pipeline_mode<synchronous>, transform_indices = @transform_1, window_bounds = array<i64: 4, 136>}, {pipeline_mode = #tpu.pipeline_mode<synchronous>, transform_indices = @transform_2, window_bounds = array<i64: 1, 136>}, {pipeline_mode = #tpu.pipeline_mode<synchronous>, transform_indices = @transform_3, window_bounds = array<i64: 32, 136>}, {pipeline_mode = #tpu.pipeline_mode<synchronous>, transform_indices = @transform_4, window_bounds = array<i64: 1, 136>}, {pipeline_mode = #tpu.pipeline_mode<synchronous>, transform_indices = @transform_5, window_bounds = array<i64: 2, 8>}, {transform_indices = @transform_6, window_bounds = array<i64: 16, 8>}]} {
    %c0 = arith.constant 0 : index
    %c0_0 = arith.constant 0 : index
    %0 = vector.load %arg1[%c0, %c0_0] : memref<16x4xbf16, #tpu.memory_space<vmem>>, vector<16x4xbf16>
    %c0_1 = arith.constant 0 : index
    %c0_2 = arith.constant 0 : index
    %1 = vector.load %arg2[%c0_1, %c0_2] : memref<4x136xbf16, #tpu.memory_space<vmem>>, vector<4x136xbf16>
    %cst = arith.constant dense<0.000000e+00> : vector<16x136xf32>
    %2 = tpu.matmul %0, %1, %cst {dimension_numbers = #tpu.dot_dimension_numbers<[1], [0], [0], [1], [0, 0, 1, 1], [], []>} : vector<16x4xbf16>, vector<4x136xbf16>, vector<16x136xf32> -> vector<16x136xf32>
    %c0_3 = arith.constant 0 : index
    %c0_4 = arith.constant 0 : index
    %3 = vector.load %arg3[%c0_3, %c0_4] : memref<1x136xf32, #tpu.memory_space<vmem>>, vector<1x136xf32>
    %4 = vector.broadcast %3 : vector<1x136xf32> to vector<16x136xf32>
    %5 = arith.addf %2, %4 : vector<16x136xf32>
    %6 = vector.extract_strided_slice %5 {offsets = [0, 0], sizes = [16, 32], strides = [1, 1]} : vector<16x136xf32> to vector<16x32xf32>
    %7 = vector.extract_strided_slice %5 {offsets = [0, 128], sizes = [16, 8], strides = [1, 1]} : vector<16x136xf32> to vector<16x8xf32>
    %cst_5 = arith.constant 0.000000e+00 : f32
    %8 = vector.broadcast %cst_5 : f32 to vector<16x32xf32>
    %9 = arith.cmpf ogt, %6, %8 : vector<16x32xf32>
    %cst_6 = arith.constant 0.000000e+00 : f32
    %10 = vector.broadcast %cst_6 : f32 to vector<16x32xf32>
    %11 = arith.minimumf %6, %10 : vector<16x32xf32>
    %12 = math.exp %11 : vector<16x32xf32>
    %cst_7 = arith.constant 1.000000e+00 : f32
    %13 = vector.broadcast %cst_7 : f32 to vector<16x32xf32>
    %14 = arith.subf %12, %13 : vector<16x32xf32>
    %15 = arith.select %9, %6, %14 : vector<16x32xi1>, vector<16x32xf32>
    %16 = arith.truncf %15 : vector<16x32xf32> to vector<16x32xbf16>
    %c0_8 = arith.constant 0 : index
    %c0_9 = arith.constant 0 : index
    %17 = vector.load %arg4[%c0_8, %c0_9] : memref<32x136xbf16, #tpu.memory_space<vmem>>, vector<32x136xbf16>
    %cst_10 = arith.constant dense<0.000000e+00> : vector<16x136xf32>
    %18 = tpu.matmul %16, %17, %cst_10 {dimension_numbers = #tpu.dot_dimension_numbers<[1], [0], [0], [1], [0, 0, 1, 1], [], []>} : vector<16x32xbf16>, vector<32x136xbf16>, vector<16x136xf32> -> vector<16x136xf32>
    %c0_11 = arith.constant 0 : index
    %c0_12 = arith.constant 0 : index
    %19 = vector.load %arg5[%c0_11, %c0_12] : memref<1x136xf32, #tpu.memory_space<vmem>>, vector<1x136xf32>
    %20 = vector.broadcast %19 : vector<1x136xf32> to vector<16x136xf32>
    %21 = arith.addf %18, %20 : vector<16x136xf32>
    %22 = vector.extract_strided_slice %21 {offsets = [0, 0], sizes = [16, 8], strides = [1, 1]} : vector<16x136xf32> to vector<16x8xf32>
    %23 = vector.extract_strided_slice %21 {offsets = [0, 128], sizes = [16, 8], strides = [1, 1]} : vector<16x136xf32> to vector<16x8xf32>
    %cst_13 = arith.constant 0.000000e+00 : f32
    %24 = vector.broadcast %cst_13 : f32 to vector<16x8xf32>
    %25 = arith.subf %24, %23 : vector<16x8xf32>
    %26 = math.exp %25 : vector<16x8xf32>
    %cst_14 = arith.constant 1.000000e+00 : f32
    %27 = vector.broadcast %cst_14 : f32 to vector<16x8xf32>
    %28 = arith.addf %27, %26 : vector<16x8xf32>
    %29 = tpu.reciprocal %28 {approx = true} : vector<16x8xf32> -> vector<16x8xf32>
    %30 = arith.mulf %22, %29 : vector<16x8xf32>
    %31 = arith.addf %30, %7 : vector<16x8xf32>
    %cst_15 = arith.constant dense<0.000000e+00> : vector<16xf32>
    %32 = vector.multi_reduction <add>, %31, %cst_15 [1] : vector<16x8xf32> to vector<16xf32>
    %33 = vector.shape_cast %32 : vector<16xf32> to vector<16x1xf32>
    %cst_16 = arith.constant 8.000000e+00 : f32
    %34 = vector.broadcast %cst_16 : f32 to vector<16x1xf32>
    %35 = arith.divf %33, %34 : vector<16x1xf32>
    %36 = vector.broadcast %35 : vector<16x1xf32> to vector<16x8xf32>
    %37 = arith.subf %31, %36 : vector<16x8xf32>
    %38 = arith.mulf %37, %37 : vector<16x8xf32>
    %cst_17 = arith.constant dense<0.000000e+00> : vector<16xf32>
    %39 = vector.multi_reduction <add>, %38, %cst_17 [1] : vector<16x8xf32> to vector<16xf32>
    %40 = vector.shape_cast %39 : vector<16xf32> to vector<16x1xf32>
    %cst_18 = arith.constant 8.000000e+00 : f32
    %41 = vector.broadcast %cst_18 : f32 to vector<16x1xf32>
    %42 = arith.divf %40, %41 : vector<16x1xf32>
    %cst_19 = arith.constant 9.99999974E-6 : f32
    %43 = vector.broadcast %cst_19 : f32 to vector<16x1xf32>
    %44 = arith.addf %42, %43 : vector<16x1xf32>
    %45 = math.rsqrt %44 : vector<16x1xf32>
    %46 = vector.broadcast %45 : vector<16x1xf32> to vector<16x8xf32>
    %47 = arith.mulf %37, %46 : vector<16x8xf32>
    %c0_20 = arith.constant 0 : index
    %c0_21 = arith.constant 0 : index
    %48 = vector.load %arg6[%c0_20, %c0_21] : memref<2x8xf32, #tpu.memory_space<vmem>>, vector<1x8xf32>
    %49 = vector.broadcast %48 : vector<1x8xf32> to vector<16x8xf32>
    %50 = arith.mulf %47, %49 : vector<16x8xf32>
    %c1 = arith.constant 1 : index
    %c0_22 = arith.constant 0 : index
    %51 = vector.load %arg6[%c1, %c0_22] : memref<2x8xf32, #tpu.memory_space<vmem>>, vector<1x8xf32>
    %52 = vector.broadcast %51 : vector<1x8xf32> to vector<16x8xf32>
    %53 = arith.addf %50, %52 : vector<16x8xf32>
    %c0_23 = arith.constant 0 : index
    %c0_24 = arith.constant 0 : index
    %54 = vector.load %arg7[%c0_23, %c0_24] : memref<16x8xf32, #tpu.memory_space<vmem>>, vector<16x8xf32>
    tpu.vector_store %arg7[%c0_23, %c0_24], %53 {strides = array<i32>} : memref<16x8xf32, #tpu.memory_space<vmem>>, vector<16x8xf32>,
    return
  }
  func.func @transform_0(%arg0: i32) -> (i32, i32) {
    %c0_i32 = arith.constant 0 : i32
    %c0_i32_0 = arith.constant 0 : i32
    return %arg0, %c0_i32 : i32, i32
  }
  func.func @transform_1(%arg0: i32) -> (i32, i32) {
    %c0_i32 = arith.constant 0 : i32
    %c0_i32_0 = arith.constant 0 : i32
    %c0_i32_1 = arith.constant 0 : i32
    return %c0_i32, %c0_i32_0 : i32, i32
  }
  func.func @transform_2(%arg0: i32) -> (i32, i32) {
    %c0_i32 = arith.constant 0 : i32
    %c0_i32_0 = arith.constant 0 : i32
    %c0_i32_1 = arith.constant 0 : i32
    return %c0_i32, %c0_i32_0 : i32, i32
  }
  func.func @transform_3(%arg0: i32) -> (i32, i32) {
    %c0_i32 = arith.constant 0 : i32
    %c0_i32_0 = arith.constant 0 : i32
    %c0_i32_1 = arith.constant 0 : i32
    return %c0_i32, %c0_i32_0 : i32, i32
  }
  func.func @transform_4(%arg0: i32) -> (i32, i32) {
    %c0_i32 = arith.constant 0 : i32
    %c0_i32_0 = arith.constant 0 : i32
    %c0_i32_1 = arith.constant 0 : i32
    return %c0_i32, %c0_i32_0 : i32, i32
  }
  func.func @transform_5(%arg0: i32) -> (i32, i32) {
    %c0_i32 = arith.constant 0 : i32
    %c0_i32_0 = arith.constant 0 : i32
    %c0_i32_1 = arith.constant 0 : i32
    return %c0_i32, %c0_i32_0 : i32, i32
  }
  func.func @transform_6(%arg0: i32) -> (i32, i32) {
    %c0_i32 = arith.constant 0 : i32
    %c0_i32_0 = arith.constant 0 : i32
    return %arg0, %c0_i32 : i32, i32
  }
}

</mosaic_0001>

<bundles_post_ra>
// kernel: tpu_custom_call.1
= control target key start
LH: loop header
LB: loop body
LE: loop exit
PB: predicated region body
PF: predicated region fallthrough
CT: control target
= control target key end

     0   :  { %11 = vsyncpa [#allocation3], 0  ;;  %s332_s24 = smov [#allocation2]   ;;  %s333_s26 = smov 128   ;;  %s412_s0 = inlined_call_operand.vmem [shape: bf16[16,4], index: 0, kind: input, shape index: {}]   ;;  %s413_s1 = inlined_call_operand.vmem [shape: bf16[4,136], index: 1, kind: input, shape index: {}]   ;;  %s414_s2 = inlined_call_operand.vmem [shape: f32[1,136], index: 2, kind: input, shape index: {}]   ;;  %s415_s3 = inlined_call_operand.hbm [shape: bf16[32,136], index: 3, kind: input, shape index: {}]   ;;  %s416_s4 = inlined_call_operand.vmem [shape: f32[1,136], index: 4, kind: input, shape index: {}]   ;;  %s417_s5 = inlined_call_operand.vmem [shape: f32[2,8], index: 5, kind: input, shape index: {}]   ;;  %s418_s6 = inlined_call_operand.vmem [shape: f32[16,8], index: 6, kind: output, shape index: {}]  }
   0x1   :  { %s22_s23 = sshll.u32 %s415_s3, 4  ;;  %s24_s25 = sshll.u32 %s332_s24, 4  ;;  %s23_s23 = int_to_ptr.hbm [resolvable:$true] %s22_s23  ;;  %s25_s25 = int_to_ptr.vmem [resolvable:$true] %s24_s25 }
   0x2   :  { %s334_s27 = smov 8  }
   0x3   :  { %30 = dma.hbm_to_vmem [thread:$0]  %s23_s23, 512, %s25_s25, [#allocation3], %s333_s26, %s333_s26, %s334_s27  }
   0x4   :  { %330 = dma.done.wait [#allocation3], 512  }
   0x5   :  { %331 = vsyncadd [#allocation3], 4294966784  ;;  %v42_v0 = vld [vmem:[%s413_s1] sm:$0xf]  ;;  %vm62_vm0 = vcmask 1041408   ;;  %vm58_vm1 = vcmask 31744  }
   0x6   :  { %55 = vst [vmem:[#allocation1] ss:$4 sm:$0xff] %v42_v0  ;;  %v277_v3 = vld [vmem:[%s412_s0] sm:$0xff]  ;;  %v269_v4 = vld [vmem:[#allocation2 + $0x10] sm:$0xf]  ;;  %vm138_vm4 = vcmask 261120  }
   0x7   :  { %v281_v5 = vld [vmem:[#allocation2 + $0x14] sm:$0xf0]  ;;  %v280_v6 = vld [vmem:[#allocation2 + $0x14] sm:$0xf]  ;;  %v271_v8 = vld [vmem:[#allocation2 + $0x18] sm:$0xf0] }
   0x8   :  { %v270_v7 = vor.u32 %v281_v5, %v269_v4  ;;  %v274_v9 = vor.u32 %v280_v6, %v271_v8  ;;  %v261_v10 = vld [vmem:[#allocation2] sm:$0xf]  ;;  %v279_v11 = vld [vmem:[#allocation2 + $0x4] sm:$0xf0]  ;;  %v278_v12 = vld [vmem:[#allocation2 + $0x4] sm:$0xf] }
   0x9   :  { %v262_v13 = vor.u32 %v279_v11, %v261_v10  ;;  %v263_v14 = vld [vmem:[#allocation2 + $0x8] sm:$0xf0]  ;;  %v385_v16 = vld [vmem:[%s414_s2] sm:$0x3]  ;;  %vm184_vm5 = vcmask 64512  }
   0xa   :  { %148 = vmatpush.bf16.msra.mxu2 %v270_v7  ;;  %162 = vmatpush.bf16.msra.mxu3 %v274_v9  ;;  %v266_v15 = vor.u32 %v278_v12, %v263_v14  ;;  %v45_v19 = vperm.slane %v385_v16, 0  ;;  %v112_v35 = vld [vmem:[%s416_s4] sm:$0x3]  ;;  %v46_v49 = vperm.slane %v385_v16, 1 }
   0xb   :  { %v115_v36 = vperm.slane %v112_v35, 1  ;;  %v114_v48 = vperm.slane %v112_v35, 0 }
   0xd   :  { %v56_v1 = vld.sshfl [vmem:[#allocation1] sm:$0xff pattern:$0x73625140]  ;;  %v57_v17 = vld.sshfl [vmem:[#allocation1 + $0x8] sm:$0xff pattern:$0x73625140] }
   0xe   :  { %v63_v2 = vsel %vm62_vm0, %v56_v1, 0  ;;  %149 = vmatpush.bf16.msra.mxu2 %v262_v13  ;;  %163 = vmatpush.bf16.msra.mxu3 %v266_v15  ;;  %v65_v18 = vsel %vm62_vm0, %v57_v17, 0 }
   0xf   :  { %74 = vmatpush.bf16.msra.mxu0 %v63_v2  ;;  %88 = vmatpush.bf16.msra.mxu1 %v65_v18 }
  0x12   :  { %255 = vmatmul.msk.bf16.vlgmr.msra.gmra.mxu0 %vm58_vm1, %v277_v3  ;;  %256 = vmatmul.msk.bf16.vlgmr.msra.gmra.mxu1 %vm58_vm1, %v277_v3  ;;  %v335_v3 = vmov 8.0  }
  0x8f   :  { %v76_v20 = vpop.f32.mrf.mxu0  ;;  %v90_v50 = vpop.f32.mrf.mxu1 }
  0x90   :  { %v77_v21 = vadd.f32 %v76_v20, %v45_v19  ;;  %v91_v53 = vadd.f32 %v90_v50, %v46_v49 }
  0x92   :  { %v97_v22 = vmin.f32 %v77_v21, 0.0  ;;  %vm95_vm2 = vcmp.gt.f32.partialorder %v77_v21, 0.0 }
  0x94   :  { %v99_v23 = vmul.f32 1.442695, %v97_v22 }
  0x96   :  { %288 = vpow2.f32 %v99_v23 }
  0x97   :  { %v78_v24 = vpop.f32.mrf.mxu0  ;;  %v92_v60 = vpop.f32.mrf.mxu1 }
  0x98   :  { %v79_v25 = vadd.f32 %v78_v24, %v45_v19  ;;  %v93_v63 = vadd.f32 %v92_v60, %v46_v49 }
  0x9a   :  { %v98_v26 = vmin.f32 %v79_v25, 0.0  ;;  %vm96_vm3 = vcmp.gt.f32.partialorder %v79_v25, 0.0 }
  0x9c   :  { %v101_v27 = vmul.f32 1.442695, %v98_v26  ;;  %v289_v28 = vpop.eup %288 }
  0x9d   :  { %v257_v29 = vadd.f32 -1.0, %v289_v28 }
  0x9e   :  { %290 = vpow2.f32 %v101_v27 }
  0x9f   :  { %v105_v32 = vsel %vm95_vm2, %v77_v21, %v257_v29 }
  0xa4   :  { %v291_v30 = vpop.eup %290 }
  0xa5   :  { %v258_v31 = vadd.f32 -1.0, %v291_v30 }
  0xa7   :  { %v106_v33 = vsel %vm96_vm3, %v79_v25, %v258_v31 }
  0xa8   :  { %v107_v34 = vpack.c.bf16 %v106_v33, %v105_v32 }
  0xaa   :  { %275 = vmatmul.msk.bf16.vlgmr.msra.gmra.mxu2 %vm138_vm4, %v107_v34  ;;  %276 = vmatmul.msk.bf16.vlgmr.msra.gmra.mxu3 %vm138_vm4, %v107_v34  ;;  %v286_v34 = vld [vmem:[%s417_s5] ss:$0 sm:$0xff] }
 0x12d   :  { %v165_v37 = vpop.f32.mrf.mxu3  ;;  %v151_v47 = vpop.f32.mrf.mxu2 }
 0x12e   :  { %v166_v38 = vadd.f32 %v165_v37, %v115_v36  ;;  %v152_v52 = vadd.f32 %v151_v47, %v114_v48  ;;  %v287_v37 = vld [vmem:[%s417_s5 + $0x1] ss:$0 sm:$0xff] }
 0x130   :  { %v170_v39 = vsub.f32 0.0, %v166_v38 }
 0x132   :  { %v172_v40 = vmul.f32 1.442695, %v170_v39 }
 0x134   :  { %292 = vpow2.f32 %v172_v40 }
 0x135   :  { %v167_v41 = vpop.f32.mrf.mxu3  ;;  %v153_v58 = vpop.f32.mrf.mxu2 }
 0x136   :  { %v168_v42 = vadd.f32 %v167_v41, %v115_v36  ;;  %v154_v61 = vadd.f32 %v153_v58, %v114_v48 }
 0x138   :  { %v171_v43 = vsub.f32 0.0, %v168_v42 }
 0x13a   :  { %v293_v44 = vpop.eup %292  ;;  %v174_v45 = vmul.f32 1.442695, %v171_v43 }
 0x13b   :  { %v176_v46 = vadd.f32 1.0, %v293_v44 }
 0x13c   :  { %294 = vpow2.f32 %v174_v45 }
 0x13d   :  { %296 = vrcp.f32 %v176_v46 }
 0x142   :  { %v295_v51 = vpop.eup %294 }
 0x143   :  { %v297_v54 = vpop.eup %296  ;;  %v177_v55 = vadd.f32 1.0, %v295_v51 }
 0x144   :  { %v180_v56 = vmul.f32 %v297_v54, %v152_v52 }
 0x145   :  { %298 = vrcp.f32 %v177_v55 }
 0x146   :  { %v182_v57 = vadd.f32 %v180_v56, %v91_v53  ;;  %300 = vrcp.f32 %v335_v3 }
 0x148   :  { %v185_v59 = vsel %vm184_vm5, %v182_v57, 0.0 }
 0x149   :  { %186 = vadd.xlane.f32.xlu0 %v185_v59 }
 0x14b   :  { %v299_v62 = vpop.eup %298 }
 0x14c   :  { %v181_v0 = vmul.f32 %v299_v62, %v154_v61  ;;  %v301_v4 = vpop.eup %300 }
 0x14d   :  { %v192_v5 = vmul.f32 8.0, %v301_v4  ;;  %vm196_vm6 = vweird.f32 %v301_v4 }
 0x14e   :  { %v183_v1 = vadd.f32 %v181_v0, %v93_v63 }
 0x14f   :  { %v193_v6 = vsub.f32 1.0, %v192_v5 }
 0x150   :  { %v188_v2 = vsel %vm184_vm5, %v183_v1, 0.0 }
 0x151   :  { %189 = vadd.xlane.f32.xlu0 %v188_v2  ;;  %v194_v7 = vmul.f32 %v301_v4, %v193_v6 }
 0x153   :  { %v195_v8 = vadd.f32 %v301_v4, %v194_v7 }
 0x155   :  { %v197_v9 = vsel %vm196_vm6, %v301_v4, %v195_v8 }
 0x1bc   :  { %v187_v10 = vpop.xlane.xlu0 %186 }
 0x1bd   :  { %v198_v11 = vmul.f32 %v197_v9, %v187_v10 }
 0x1bf   :  { %v200_v12 = vsub.f32 %v182_v57, %v198_v11 }
 0x1c1   :  { %v202_v13 = vmul.f32 %v200_v12, %v200_v12 }
 0x1c3   :  { %v204_v14 = vsel %vm184_vm5, %v202_v13, 0.0 }
 0x1c4   :  { %205 = vadd.xlane.f32.xlu1 %v204_v14  ;;  %v190_v15 = vpop.xlane.xlu0 %189 }
 0x1c5   :  { %v199_v16 = vmul.f32 %v197_v9, %v190_v15 }
 0x1c7   :  { %v201_v17 = vsub.f32 %v183_v1, %v199_v16 }
 0x1c9   :  { %v203_v18 = vmul.f32 %v201_v17, %v201_v17 }
 0x1cb   :  { %v207_v19 = vsel %vm184_vm5, %v203_v18, 0.0 }
 0x1cc   :  { %208 = vadd.xlane.f32.xlu1 %v207_v19 }
 0x237   :  { %v206_v20 = vpop.xlane.xlu1 %205 }
 0x238   :  { %v210_v21 = vmul.f32 %v206_v20, %v197_v9 }
 0x23a   :  { %v212_v22 = vadd.f32 1e-05, %v210_v21 }
 0x23c   :  { %302 = vrsqrt.f32 %v212_v22  ;;  %vm220_vm8 = vweird.f32 %v212_v22 }
 0x23f   :  { %v209_v23 = vpop.xlane.xlu1 %208 }
 0x240   :  { %v211_v24 = vmul.f32 %v209_v23, %v197_v9 }
 0x242   :  { %v303_v25 = vpop.eup %302  ;;  %v213_v26 = vadd.f32 1e-05, %v211_v24 }
 0x243   :  { %v215_v27 = vmul.f32 %v303_v25, %v212_v22  ;;  %vm221_vm7 = vweird.f32 %v303_v25 }
 0x244   :  { %304 = vrsqrt.f32 %v213_v26  ;;  %vm222_vm9 = vmor %vm220_vm8, %vm221_vm7  ;;  %vm230_vm11 = vweird.f32 %v213_v26 }
 0x245   :  { %v216_v28 = vmul.f32 %v303_v25, %v215_v27 }
 0x247   :  { %v217_v29 = vmul.f32 0.5, %v216_v28 }
 0x249   :  { %v218_v30 = vsub.f32 1.5, %v217_v29 }
 0x24a   :  { %v305_v31 = vpop.eup %304 }
 0x24b   :  { %v219_v32 = vmul.f32 %v303_v25, %v218_v30  ;;  %v225_v33 = vmul.f32 %v305_v31, %v213_v26  ;;  %vm231_vm10 = vweird.f32 %v305_v31 }
 0x24c   :  { %vm232_vm12 = vmor %vm230_vm11, %vm231_vm10 }
 0x24d   :  { %v223_v35 = vsel %vm222_vm9, %v303_v25, %v219_v32  ;;  %v226_v36 = vmul.f32 %v305_v31, %v225_v33 }
 0x24e   :  { %v234_v38 = vmul.f32 %v223_v35, %v200_v12 }
 0x24f   :  { %v227_v39 = vmul.f32 0.5, %v226_v36 }
 0x250   :  { %v238_v40 = vmul.f32 %v286_v34, %v234_v38 }
 0x251   :  { %v228_v41 = vsub.f32 1.5, %v227_v39 }
 0x252   :  { %v242_v42 = vadd.f32 %v287_v37, %v238_v40 }
 0x253   :  { %v229_v43 = vmul.f32 %v305_v31, %v228_v41 }
 0x254   :  { %244 = vst.msk [vmem:[%s418_s6] sm:$0xff] %vm184_vm5, %v242_v42 }
 0x255   :  { %v233_v44 = vsel %vm232_vm12, %v305_v31, %v229_v43 }
 0x256   :  { %v235_v45 = vmul.f32 %v233_v44, %v201_v17 }
 0x258   :  { %v239_v46 = vmul.f32 %v286_v34, %v235_v45 }
 0x25a   :  { %v243_v47 = vadd.f32 %v287_v37, %v239_v46 }
 0x25c   :  { %245 = vst.msk [vmem:[%s418_s6 + $0x8] sm:$0xff] %vm184_vm5, %v243_v47 }
 0x25d   :  { %250 = vsyncpa [#allocation3], 1 }

</bundles_post_ra>
